<compile_context>
chip_gen: v7x
topology: tpu7x:2x2x1
jax: 0.10.0
libtpu: 0.0.40
codegen_flags: <defaults>
</compile_context>

<pallas_src>
import jax
import jax.numpy as jnp
from jax import lax
from jax.experimental import pallas as pl
from jax.experimental.pallas import tpu as pltpu


def _round_up(v, m):
    return (v + m - 1) // m * m


def _global_sa_kernel(lo_ref, hi_ref,                 # scalar prefetch (SMEM): [cores, tiles] graph-id range
                      x_ref, pos_ref, seg_ref,        # node tiles: [T,C], [T,3], [T,1]
                      w1x_ref, w1p_ref, b1_ref,       # layer 1, split over [x | pos]
                      w2_ref, b2_ref, s2_ref, t2_ref,  # layer 2 (BN1 folded in) + BN2 scale/shift
                      out_ref):                       # [B_pad, F_pad] per-core resident accumulator
    core = pl.program_id(0)
    i = pl.program_id(1)
    NEG = jnp.float32(-1e30)

    @pl.when(i == 0)
    def _():
        out_ref[...] = jnp.full(out_ref.shape, NEG, dtype=out_ref.dtype)

    # layer 1: Linear([x|pos]) -> ReLU   (BN1 is folded into layer-2 weights)
    h = (jnp.dot(x_ref[...], w1x_ref[...], preferred_element_type=jnp.float32)
         + jnp.dot(pos_ref[...], w1p_ref[...], preferred_element_type=jnp.float32)
         + b1_ref[...])
    h = jnp.maximum(h, 0.0)

    # layer 2: Linear -> ReLU -> BN2(eval, folded to per-feature scale/shift)
    h = jnp.dot(h.astype(w2_ref.dtype), w2_ref[...],
                preferred_element_type=jnp.float32) + b2_ref[...]
    h = jnp.maximum(h, 0.0)
    h = h * s2_ref[...] + t2_ref[...]                 # [TILE_N, F_pad] f32

    # --- segment max pool ------------------------------------------------
    seg = seg_ref[...]                                # [TILE_N, 1] int32, -1 == padding
    lo = lo_ref[core, i]
    hi = hi_ref[core, i]

    # Fast path (common case: a contiguous node tile spans at most 2 graphs):
    # straight-line masked maxes + O(F) single-row updates.
    c0 = jnp.max(jnp.where(seg == lo, h, NEG), axis=0, keepdims=True)        # [1, F_pad]
    c1 = jnp.max(jnp.where(seg == lo + 1, h, NEG), axis=0, keepdims=True)    # [1, F_pad]

    @pl.when(lo <= hi)
    def _():
        out_ref[pl.ds(lo, 1), :] = jnp.maximum(out_ref[pl.ds(lo, 1), :], c0)

    @pl.when(lo + 1 <= hi)
    def _():
        out_ref[pl.ds(lo + 1, 1), :] = jnp.maximum(out_ref[pl.ds(lo + 1, 1), :], c1)

    # Rare path: more than 2 graphs inside one tile (tiny graphs).  Zero
    # iterations in the common case.
    def body(b, carry):
        contrib = jnp.max(jnp.where(seg == b, h, NEG), axis=0, keepdims=True)
        out_ref[pl.ds(b, 1), :] = jnp.maximum(out_ref[pl.ds(b, 1), :], contrib)
        return carry

    lax.fori_loop(lo + 2, hi + 1, body, 0)


def global_sa_module(x, pos, batch, params, num_graphs, *,
                     tile_n=1024, matmul_dtype=jnp.bfloat16, core_splits=2):
    """GlobalSAModule forward with a 2-layer MLP ([Linear->ReLU->BN] x 2).

    `batch` must be sorted (PyG convention).  matmul_dtype=jnp.float32 is the
    bit-tight debug path; bf16 (default) is MXU-native on all generations.
    """
    n, c_in = x.shape
    (w1, b1, g1, be1, rm1, rv1), (w2, b2, g2, be2, rm2, rv2) = params
    eps = 1e-5
    s1 = g1 / jnp.sqrt(rv1 + eps)
    t1 = be1 - rm1 * s1
    s2 = g2 / jnp.sqrt(rv2 + eps)
    t2 = be2 - rm2 * s2

    # Fold BN1 (eval) exactly into layer 2:
    #   (relu1*s1 + t1) @ w2 + b2 == relu1 @ (s1[:,None]*w2) + (t1 @ w2 + b2)
    w2f = s1[:, None] * w2
    b2f = t1 @ w2 + b2

    h_dim, f_out = w1.shape[1], w2.shape[1]
    h_pad = _round_up(h_dim, 128)            # lane-dense hidden width
    f_pad = _round_up(f_out, 128)            # lane-dense output width
    b_pad = _round_up(max(num_graphs, 1), 8)  # sublane-clean accumulator rows

    def pad2(a, rows, cols, dtype=jnp.float32):
        out = jnp.zeros((rows, cols), dtype)
        return out.at[:a.shape[0], :a.shape[1]].set(a.astype(dtype))

    w1x = pad2(w1[:c_in], c_in, h_pad, matmul_dtype)   # x part of first Linear
    w1p = pad2(w1[c_in:], 3, h_pad, matmul_dtype)      # pos part of first Linear
    b1p = pad2(b1.reshape(1, -1), 1, h_pad)            # f32 bias
    w2p = pad2(w2f, h_pad, f_pad, matmul_dtype)
    b2p = pad2(b2f.reshape(1, -1), 1, f_pad)
    s2p = pad2(s2.reshape(1, -1), 1, f_pad)
    t2p = pad2(t2.reshape(1, -1), 1, f_pad)

    # Node-axis tiling + 2-way core split (partial max per core slab).
    tile_n = _round_up(max(16, min(tile_n, n)), 16)
    tiles_per_core = pl.cdiv(pl.cdiv(n, tile_n), core_splits)
    num_tiles = core_splits * tiles_per_core
    n_pad = num_tiles * tile_n

    if n_pad == n:
        # Common case: no extra HBM pass to materialize padded copies.
        x_p = x.astype(matmul_dtype)
        pos_p = pos.astype(matmul_dtype)
        seg_flat = batch.astype(jnp.int32)
    else:
        x_p = jnp.zeros((n_pad, c_in), matmul_dtype).at[:n].set(x.astype(matmul_dtype))
        pos_p = jnp.zeros((n_pad, 3), matmul_dtype).at[:n].set(pos.astype(matmul_dtype))
        seg_flat = jnp.full((n_pad,), -1, jnp.int32).at[:n].set(batch.astype(jnp.int32))
    seg_p = seg_flat.reshape(n_pad, 1)

    # Per-tile [lo, hi] graph-id range (batch sorted => each tile spans a small
    # contiguous range of graphs).  All-padding tiles get an empty range.
    seg_tiles = seg_flat.reshape(core_splits, tiles_per_core, tile_n)
    valid = seg_tiles >= 0
    lo = jnp.min(jnp.where(valid, seg_tiles, num_graphs), axis=-1).astype(jnp.int32)
    hi = jnp.max(jnp.where(valid, seg_tiles, -1), axis=-1).astype(jnp.int32)

    itemsize = jnp.dtype(matmul_dtype).itemsize
    cost = pl.CostEstimate(
        flops=2 * n_pad * ((c_in + 3) * h_pad + h_pad * f_pad),
        transcendentals=0,
        bytes_accessed=(n_pad * (c_in + 3) * itemsize + n_pad * 4
                        + (c_in + 3 + h_pad + 4) * h_pad * itemsize
                        + core_splits * b_pad * f_pad * 4),
    )

    def node_map(c, i, lo_r, hi_r):
        return (c * tiles_per_core + i, 0)

    def const_map(c, i, lo_r, hi_r):
        return (0, 0)

    grid_spec = pltpu.PrefetchScalarGridSpec(
        num_scalar_prefetch=2,
        grid=(core_splits, tiles_per_core),
        in_specs=[
            pl.BlockSpec((tile_n, c_in), node_map),
            pl.BlockSpec((tile_n, 3), node_map),
            pl.BlockSpec((tile_n, 1), node_map),
            pl.BlockSpec((c_in, h_pad), const_map),
            pl.BlockSpec((3, h_pad), const_map),
            pl.BlockSpec((1, h_pad), const_map),
            pl.BlockSpec((h_pad, f_pad), const_map),
            pl.BlockSpec((1, f_pad), const_map),
            pl.BlockSpec((1, f_pad), const_map),
            pl.BlockSpec((1, f_pad), const_map),
        ],
        out_specs=pl.BlockSpec((None, b_pad, f_pad),
                               lambda c, i, lo_r, hi_r: (c, 0, 0)),
    )

    slabs = pl.pallas_call(
        _global_sa_kernel,
        out_shape=jax.ShapeDtypeStruct((core_splits, b_pad, f_pad), jnp.float32),
        grid_spec=grid_spec,
        compiler_params=pltpu.CompilerParams(
            # core axis is independent (per-core partial max) -> "parallel";
            # node-tile axis revisits the accumulator -> "arbitrary".
            dimension_semantics=("parallel", "arbitrary"),
            vmem_limit_bytes=32 * 1024 * 1024,
        ),
        cost_estimate=cost,
    )(lo, hi, x_p, pos_p, seg_p, w1x, w1p, b1p, w2p, b2p, s2p, t2p)

    pooled = jnp.max(slabs, axis=0)[:num_graphs, :f_out]
    pos_out = jnp.zeros((num_graphs, 3), dtype=pos.dtype)
    batch_out = jnp.arange(num_graphs, dtype=batch.dtype)
    return pooled, pos_out, batch_out


def _reference(x, pos, batch, params, num_graphs):
    """Pure-JAX reference for correctness check (un-fused, un-folded)."""
    h = jnp.concatenate([x, pos], axis=1).astype(jnp.float32)
    eps = 1e-5
    for (w, b, g, be, rm, rv) in params:
        h = jnp.maximum(h @ w + b, 0.0)
        h = g * (h - rm) / jnp.sqrt(rv + eps) + be
    mask = batch[None, :] == jnp.arange(num_graphs, dtype=batch.dtype)[:, None]
    masked = jnp.where(mask[:, :, None], h[None, :, :], -1e30)
    return jnp.max(masked, axis=1)


def _make_mlp_params(key, channels):
    """Deterministic params for MLP([c0, c1, c2]) = [Lin -> ReLU -> BN] per layer."""
    params = []
    for cin, cout in zip(channels[:-1], channels[1:]):
        key, kw, kb, kg, kbe, km, kv = jax.random.split(key, 7)
        scale = 1.0 / jnp.sqrt(jnp.float32(cin))
        w = jax.random.uniform(kw, (cin, cout), jnp.float32, -scale, scale)
        b = jax.random.uniform(kb, (cout,), jnp.float32, -scale, scale)
        gamma = 1.0 + 0.1 * jax.random.normal(kg, (cout,), jnp.float32)
        beta = 0.1 * jax.random.normal(kbe, (cout,), jnp.float32)
        run_mean = 0.1 * jax.random.normal(km, (cout,), jnp.float32)
        run_var = jnp.abs(jax.random.normal(kv, (cout,), jnp.float32)) + 0.5
        params.append((w, b, gamma, beta, run_mean, run_var))
    return params


if __name__ == "__main__":
    key = jax.random.PRNGKey(0)
    kx, kp, kparam = jax.random.split(key, 3)

    # Small shapes: 4 graphs with uneven sizes (exercises 1-, 2- and 3-graph
    # tiles, both core slabs and the cross-tile accumulation), 4 input
    # features, MLP [7 -> 32 -> 64].
    num_graphs = 4
    sizes = [4, 5, 7, 16]
    n = sum(sizes)                       # 32 nodes
    c_in = 4
    channels = [c_in + 3, 32, 64]

    x = jax.random.normal(kx, (n, c_in), jnp.float32)
    pos = jax.random.normal(kp, (n, 3), jnp.float32)
    batch = jnp.repeat(jnp.arange(num_graphs, dtype=jnp.int32),
                       jnp.array(sizes), total_repeat_length=n)

    params = _make_mlp_params(kparam, channels)

    # tile_n=16 so the demo actually exercises the tiled grid + accumulator path.
    out_x, out_pos, out_batch = global_sa_module(
        x, pos, batch, params, num_graphs, tile_n=16)            # bf16 default
    out_x32, _, _ = global_sa_module(
        x, pos, batch, params, num_graphs, tile_n=16,
        matmul_dtype=jnp.float32)                                 # f32 debug path
    jax.block_until_ready((out_x, out_x32, out_pos, out_batch))

    ref = _reference(x, pos, batch, params, num_graphs)
    assert out_x.shape == (num_graphs, channels[-1])
    assert out_pos.shape == (num_graphs, 3)
    assert out_batch.shape == (num_graphs,)
    assert jnp.allclose(out_x32, ref, rtol=5e-3, atol=5e-3)
    assert jnp.allclose(out_x, ref, rtol=5e-2, atol=5e-2)

    print("KERNEL_OK")
</pallas_src>

<mosaic_0001>
module attributes {stable_mosaic.version = 11 : i64} {
  func.func @_global_sa_kernel(%arg0: i32, %arg1: i32, %arg2: memref<2x1xi32, #tpu.memory_space<smem>>, %arg3: memref<2x1xi32, #tpu.memory_space<smem>>, %arg4: memref<16x4xbf16, #tpu.memory_space<vmem>>, %arg5: memref<16x3xbf16, #tpu.memory_space<vmem>>, %arg6: memref<16x1xi32, #tpu.memory_space<vmem>>, %arg7: memref<4x128xbf16, #tpu.memory_space<vmem>>, %arg8: memref<3x128xbf16, #tpu.memory_space<vmem>>, %arg9: memref<1x128xf32, #tpu.memory_space<vmem>>, %arg10: memref<128x128xbf16, #tpu.memory_space<vmem>>, %arg11: memref<1x128xf32, #tpu.memory_space<vmem>>, %arg12: memref<1x128xf32, #tpu.memory_space<vmem>>, %arg13: memref<1x128xf32, #tpu.memory_space<vmem>>, %arg14: memref<1x8x128xf32, #tpu.memory_space<vmem>>) attributes {dimension_semantics = [#tpu.dimension_semantics<parallel>, #tpu.dimension_semantics<arbitrary>], iteration_bounds = array<i64: 2, 1>, scalar_prefetch = 2 : i64, scratch_operands = 0 : i64, tpu.core_type = #tpu.core_type<tc>, window_params = [{transform_indices = @transform_0, window_bounds = array<i64: 16, 4>}, {transform_indices = @transform_1, window_bounds = array<i64: 16, 3>}, {transform_indices = @transform_2, window_bounds = array<i64: 16, 1>}, {pipeline_mode = #tpu.pipeline_mode<synchronous>, transform_indices = @transform_3, window_bounds = array<i64: 4, 128>}, {pipeline_mode = #tpu.pipeline_mode<synchronous>, transform_indices = @transform_4, window_bounds = array<i64: 3, 128>}, {pipeline_mode = #tpu.pipeline_mode<synchronous>, transform_indices = @transform_5, window_bounds = array<i64: 1, 128>}, {pipeline_mode = #tpu.pipeline_mode<synchronous>, transform_indices = @transform_6, window_bounds = array<i64: 128, 128>}, {pipeline_mode = #tpu.pipeline_mode<synchronous>, transform_indices = @transform_7, window_bounds = array<i64: 1, 128>}, {pipeline_mode = #tpu.pipeline_mode<synchronous>, transform_indices = @transform_8, window_bounds = array<i64: 1, 128>}, {pipeline_mode = #tpu.pipeline_mode<synchronous>, transform_indices = @transform_9, window_bounds = array<i64: 1, 128>}, {transform_indices = @transform_10, window_bounds = array<i64: 1, 8, 128>}]} {
    %c0_i32 = arith.constant 0 : i32
    %0 = arith.cmpi eq, %arg1, %c0_i32 : i32
    %1 = arith.extui %0 : i1 to i32
    %cst = arith.constant -1.000000e+30 : f32
    %c0_i32_0 = arith.constant 0 : i32
    %2 = arith.cmpi ne, %1, %c0_i32_0 : i32
    scf.if %2 {
      %64 = vector.broadcast %cst : f32 to vector<8x128xf32>
      %c0_36 = arith.constant 0 : index
      %c0_37 = arith.constant 0 : index
      %c0_38 = arith.constant 0 : index
      %65 = vector.load %arg14[%c0_36, %c0_37, %c0_38] : memref<1x8x128xf32, #tpu.memory_space<vmem>>, vector<1x8x128xf32>
      %66 = vector.shape_cast %65 : vector<1x8x128xf32> to vector<8x128xf32>
      %67 = vector.shape_cast %64 : vector<8x128xf32> to vector<1x8x128xf32>
      tpu.vector_store %arg14[%c0_36, %c0_37, %c0_38], %67 {strides = array<i32>} : memref<1x8x128xf32, #tpu.memory_space<vmem>>, vector<1x8x128xf32>,
    } else {
    }
    %c0 = arith.constant 0 : index
    %c0_1 = arith.constant 0 : index
    %3 = vector.load %arg4[%c0, %c0_1] : memref<16x4xbf16, #tpu.memory_space<vmem>>, vector<16x4xbf16>
    %c0_2 = arith.constant 0 : index
    %c0_3 = arith.constant 0 : index
    %4 = vector.load %arg7[%c0_2, %c0_3] : memref<4x128xbf16, #tpu.memory_space<vmem>>, vector<4x128xbf16>
    %cst_4 = arith.constant dense<0.000000e+00> : vector<16x128xf32>
    %5 = tpu.matmul %3, %4, %cst_4 {dimension_numbers = #tpu.dot_dimension_numbers<[1], [0], [0], [1], [0, 0, 1, 1], [], []>} : vector<16x4xbf16>, vector<4x128xbf16>, vector<16x128xf32> -> vector<16x128xf32>
    %c0_5 = arith.constant 0 : index
    %c0_6 = arith.constant 0 : index
    %6 = vector.load %arg5[%c0_5, %c0_6] : memref<16x3xbf16, #tpu.memory_space<vmem>>, vector<16x3xbf16>
    %c0_7 = arith.constant 0 : index
    %c0_8 = arith.constant 0 : index
    %7 = vector.load %arg8[%c0_7, %c0_8] : memref<3x128xbf16, #tpu.memory_space<vmem>>, vector<3x128xbf16>
    %cst_9 = arith.constant dense<0.000000e+00> : vector<16x128xf32>
    %8 = tpu.matmul %6, %7, %cst_9 {dimension_numbers = #tpu.dot_dimension_numbers<[1], [0], [0], [1], [0, 0, 1, 1], [], []>} : vector<16x3xbf16>, vector<3x128xbf16>, vector<16x128xf32> -> vector<16x128xf32>
    %9 = arith.addf %5, %8 : vector<16x128xf32>
    %c0_10 = arith.constant 0 : index
    %c0_11 = arith.constant 0 : index
    %10 = vector.load %arg9[%c0_10, %c0_11] : memref<1x128xf32, #tpu.memory_space<vmem>>, vector<1x128xf32>
    %11 = vector.broadcast %10 : vector<1x128xf32> to vector<16x128xf32>
    %12 = arith.addf %9, %11 : vector<16x128xf32>
    %cst_12 = arith.constant 0.000000e+00 : f32
    %13 = vector.broadcast %cst_12 : f32 to vector<16x128xf32>
    %14 = arith.maximumf %12, %13 : vector<16x128xf32>
    %15 = arith.truncf %14 : vector<16x128xf32> to vector<16x128xbf16>
    %c0_13 = arith.constant 0 : index
    %c0_14 = arith.constant 0 : index
    %16 = vector.load %arg10[%c0_13, %c0_14] : memref<128x128xbf16, #tpu.memory_space<vmem>>, vector<128x128xbf16>
    %cst_15 = arith.constant dense<0.000000e+00> : vector<16x128xf32>
    %17 = tpu.matmul %15, %16, %cst_15 {dimension_numbers = #tpu.dot_dimension_numbers<[1], [0], [0], [1], [0, 0, 1, 1], [], []>} : vector<16x128xbf16>, vector<128x128xbf16>, vector<16x128xf32> -> vector<16x128xf32>
    %c0_16 = arith.constant 0 : index
    %c0_17 = arith.constant 0 : index
    %18 = vector.load %arg11[%c0_16, %c0_17] : memref<1x128xf32, #tpu.memory_space<vmem>>, vector<1x128xf32>
    %19 = vector.broadcast %18 : vector<1x128xf32> to vector<16x128xf32>
    %20 = arith.addf %17, %19 : vector<16x128xf32>
    %cst_18 = arith.constant 0.000000e+00 : f32
    %21 = vector.broadcast %cst_18 : f32 to vector<16x128xf32>
    %22 = arith.maximumf %20, %21 : vector<16x128xf32>
    %c0_19 = arith.constant 0 : index
    %c0_20 = arith.constant 0 : index
    %23 = vector.load %arg12[%c0_19, %c0_20] : memref<1x128xf32, #tpu.memory_space<vmem>>, vector<1x128xf32>
    %24 = vector.broadcast %23 : vector<1x128xf32> to vector<16x128xf32>
    %25 = arith.mulf %22, %24 : vector<16x128xf32>
    %c0_21 = arith.constant 0 : index
    %c0_22 = arith.constant 0 : index
    %26 = vector.load %arg13[%c0_21, %c0_22] : memref<1x128xf32, #tpu.memory_space<vmem>>, vector<1x128xf32>
    %27 = vector.broadcast %26 : vector<1x128xf32> to vector<16x128xf32>
    %28 = arith.addf %25, %27 : vector<16x128xf32>
    %c0_23 = arith.constant 0 : index
    %c0_24 = arith.constant 0 : index
    %29 = vector.load %arg6[%c0_23, %c0_24] : memref<16x1xi32, #tpu.memory_space<vmem>>, vector<16x1xi32>
    %30 = arith.index_cast %arg0 : i32 to index
    %31 = arith.index_cast %arg1 : i32 to index
    %32 = memref.load %arg2[%30, %31] : memref<2x1xi32, #tpu.memory_space<smem>>
    %33 = arith.index_cast %arg0 : i32 to index
    %34 = arith.index_cast %arg1 : i32 to index
    %35 = memref.load %arg3[%33, %34] : memref<2x1xi32, #tpu.memory_space<smem>>
    %36 = vector.broadcast %32 : i32 to vector<16x1xi32>
    %37 = arith.cmpi eq, %29, %36 : vector<16x1xi32>
    %cst_25 = arith.constant -1.000000e+30 : f32
    %38 = vector.shape_cast %37 : vector<16x1xi1> to vector<16x1xi1>
    %39 = vector.broadcast %38 : vector<16x1xi1> to vector<16x128xi1>
    %40 = vector.broadcast %cst_25 : f32 to vector<16x128xf32>
    %41 = arith.select %39, %28, %40 : vector<16x128xi1>, vector<16x128xf32>
    %cst_26 = arith.constant dense<0xFF800000> : vector<128xf32>
    %42 = vector.multi_reduction <maximumf>, %41, %cst_26 [0] : vector<16x128xf32> to vector<128xf32>
    %43 = vector.shape_cast %42 : vector<128xf32> to vector<1x128xf32>
    %c1_i32 = arith.constant 1 : i32
    %44 = arith.addi %32, %c1_i32 : i32
    %45 = vector.broadcast %44 : i32 to vector<16x1xi32>
    %46 = arith.cmpi eq, %29, %45 : vector<16x1xi32>
    %cst_27 = arith.constant -1.000000e+30 : f32
    %47 = vector.shape_cast %46 : vector<16x1xi1> to vector<16x1xi1>
    %48 = vector.broadcast %47 : vector<16x1xi1> to vector<16x128xi1>
    %49 = vector.broadcast %cst_27 : f32 to vector<16x128xf32>
    %50 = arith.select %48, %28, %49 : vector<16x128xi1>, vector<16x128xf32>
    %cst_28 = arith.constant dense<0xFF800000> : vector<128xf32>
    %51 = vector.multi_reduction <maximumf>, %50, %cst_28 [0] : vector<16x128xf32> to vector<128xf32>
    %52 = vector.shape_cast %51 : vector<128xf32> to vector<1x128xf32>
    %53 = arith.cmpi sle, %32, %35 : i32
    %54 = arith.extui %53 : i1 to i32
    %c0_i32_29 = arith.constant 0 : i32
    %55 = arith.cmpi ne, %54, %c0_i32_29 : i32
    scf.if %55 {
      %c0_36 = arith.constant 0 : index
      %64 = arith.index_cast %32 : i32 to index
      %c0_37 = arith.constant 0 : index
      %65 = vector.load %arg14[%c0_36, %64, %c0_37] : memref<1x8x128xf32, #tpu.memory_space<vmem>>, vector<1x1x128xf32>
      %66 = vector.shape_cast %65 : vector<1x1x128xf32> to vector<1x128xf32>
      %67 = arith.maximumf %66, %43 : vector<1x128xf32>
      %c0_38 = arith.constant 0 : index
      %68 = arith.index_cast %32 : i32 to index
      %c0_39 = arith.constant 0 : index
      %69 = vector.load %arg14[%c0_38, %68, %c0_39] : memref<1x8x128xf32, #tpu.memory_space<vmem>>, vector<1x1x128xf32>
      %70 = vector.shape_cast %69 : vector<1x1x128xf32> to vector<1x128xf32>
      %71 = vector.shape_cast %67 : vector<1x128xf32> to vector<1x1x128xf32>
      tpu.vector_store %arg14[%c0_38, %68, %c0_39], %71 {strides = array<i32>} : memref<1x8x128xf32, #tpu.memory_space<vmem>>, vector<1x1x128xf32>,
    } else {
    }
    %c1_i32_30 = arith.constant 1 : i32
    %56 = arith.addi %32, %c1_i32_30 : i32
    %57 = arith.cmpi sle, %56, %35 : i32
    %58 = arith.extui %57 : i1 to i32
    %c0_i32_31 = arith.constant 0 : i32
    %59 = arith.cmpi ne, %58, %c0_i32_31 : i32
    scf.if %59 {
      %c1_i32_36 = arith.constant 1 : i32
      %64 = arith.addi %32, %c1_i32_36 : i32
      %c0_37 = arith.constant 0 : index
      %65 = arith.index_cast %64 : i32 to index
      %c0_38 = arith.constant 0 : index
      %66 = vector.load %arg14[%c0_37, %65, %c0_38] : memref<1x8x128xf32, #tpu.memory_space<vmem>>, vector<1x1x128xf32>
      %67 = vector.shape_cast %66 : vector<1x1x128xf32> to vector<1x128xf32>
      %68 = arith.maximumf %67, %52 : vector<1x128xf32>
      %c1_i32_39 = arith.constant 1 : i32
      %69 = arith.addi %32, %c1_i32_39 : i32
      %c0_40 = arith.constant 0 : index
      %70 = arith.index_cast %69 : i32 to index
      %c0_41 = arith.constant 0 : index
      %71 = vector.load %arg14[%c0_40, %70, %c0_41] : memref<1x8x128xf32, #tpu.memory_space<vmem>>, vector<1x1x128xf32>
      %72 = vector.shape_cast %71 : vector<1x1x128xf32> to vector<1x128xf32>
      %73 = vector.shape_cast %68 : vector<1x128xf32> to vector<1x1x128xf32>
      tpu.vector_store %arg14[%c0_40, %70, %c0_41], %73 {strides = array<i32>} : memref<1x8x128xf32, #tpu.memory_space<vmem>>, vector<1x1x128xf32>,
    } else {
    }
    %c2_i32 = arith.constant 2 : i32
    %60 = arith.addi %32, %c2_i32 : i32
    %c1_i32_32 = arith.constant 1 : i32
    %61 = arith.addi %35, %c1_i32_32 : i32
    %c0_i32_33 = arith.constant 0 : i32
    %cst_34 = arith.constant -1.000000e+30 : f32
    %62 = arith.subi %61, %60 : i32
    %63 = arith.addi %60, %62 : i32
    %c1_i32_35 = arith.constant 1 : i32
    scf.for %arg15 = %60 to %63 step %c1_i32_35  : i32 {
      %64 = vector.broadcast %arg15 : i32 to vector<16x1xi32>
      %65 = arith.cmpi eq, %29, %64 : vector<16x1xi32>
      %66 = vector.shape_cast %65 : vector<16x1xi1> to vector<16x1xi1>
      %67 = vector.broadcast %66 : vector<16x1xi1> to vector<16x128xi1>
      %68 = vector.broadcast %cst_34 : f32 to vector<16x128xf32>
      %69 = arith.select %67, %28, %68 : vector<16x128xi1>, vector<16x128xf32>
      %cst_36 = arith.constant dense<0xFF800000> : vector<128xf32>
      %70 = vector.multi_reduction <maximumf>, %69, %cst_36 [0] : vector<16x128xf32> to vector<128xf32>
      %71 = vector.shape_cast %70 : vector<128xf32> to vector<1x128xf32>
      %c0_37 = arith.constant 0 : index
      %72 = arith.index_cast %arg15 : i32 to index
      %c0_38 = arith.constant 0 : index
      %73 = vector.load %arg14[%c0_37, %72, %c0_38] : memref<1x8x128xf32, #tpu.memory_space<vmem>>, vector<1x1x128xf32>
      %74 = vector.shape_cast %73 : vector<1x1x128xf32> to vector<1x128xf32>
      %75 = arith.maximumf %74, %71 : vector<1x128xf32>
      %c0_39 = arith.constant 0 : index
      %76 = arith.index_cast %arg15 : i32 to index
      %c0_40 = arith.constant 0 : index
      %77 = vector.load %arg14[%c0_39, %76, %c0_40] : memref<1x8x128xf32, #tpu.memory_space<vmem>>, vector<1x1x128xf32>
      %78 = vector.shape_cast %77 : vector<1x1x128xf32> to vector<1x128xf32>
      %79 = vector.shape_cast %75 : vector<1x128xf32> to vector<1x1x128xf32>
      tpu.vector_store %arg14[%c0_39, %76, %c0_40], %79 {strides = array<i32>} : memref<1x8x128xf32, #tpu.memory_space<vmem>>, vector<1x1x128xf32>,
    }
    return
  }
  func.func @transform_0(%arg0: i32, %arg1: i32, %arg2: memref<2x1xi32, #tpu.memory_space<smem>>, %arg3: memref<2x1xi32, #tpu.memory_space<smem>>) -> (i32, i32) {
    %c1_i32 = arith.constant 1 : i32
    %0 = arith.muli %arg0, %c1_i32 : i32
    %1 = arith.addi %0, %arg1 : i32
    %c0_i32 = arith.constant 0 : i32
    %c0_i32_0 = arith.constant 0 : i32
    return %1, %c0_i32 : i32, i32
  }
  func.func @transform_1(%arg0: i32, %arg1: i32, %arg2: memref<2x1xi32, #tpu.memory_space<smem>>, %arg3: memref<2x1xi32, #tpu.memory_space<smem>>) -> (i32, i32) {
    %c1_i32 = arith.constant 1 : i32
    %0 = arith.muli %arg0, %c1_i32 : i32
    %1 = arith.addi %0, %arg1 : i32
    %c0_i32 = arith.constant 0 : i32
    %c0_i32_0 = arith.constant 0 : i32
    return %1, %c0_i32 : i32, i32
  }
  func.func @transform_2(%arg0: i32, %arg1: i32, %arg2: memref<2x1xi32, #tpu.memory_space<smem>>, %arg3: memref<2x1xi32, #tpu.memory_space<smem>>) -> (i32, i32) {
    %c1_i32 = arith.constant 1 : i32
    %0 = arith.muli %arg0, %c1_i32 : i32
    %1 = arith.addi %0, %arg1 : i32
    %c0_i32 = arith.constant 0 : i32
    %c0_i32_0 = arith.constant 0 : i32
    return %1, %c0_i32 : i32, i32
  }
  func.func @transform_3(%arg0: i32, %arg1: i32, %arg2: memref<2x1xi32, #tpu.memory_space<smem>>, %arg3: memref<2x1xi32, #tpu.memory_space<smem>>) -> (i32, i32) {
    %c0_i32 = arith.constant 0 : i32
    %c0_i32_0 = arith.constant 0 : i32
    %c0_i32_1 = arith.constant 0 : i32
    return %c0_i32, %c0_i32_0 : i32, i32
  }
  func.func @transform_4(%arg0: i32, %arg1: i32, %arg2: memref<2x1xi32, #tpu.memory_space<smem>>, %arg3: memref<2x1xi32, #tpu.memory_space<smem>>) -> (i32, i32) {
    %c0_i32 = arith.constant 0 : i32
    %c0_i32_0 = arith.constant 0 : i32
    %c0_i32_1 = arith.constant 0 : i32
    return %c0_i32, %c0_i32_0 : i32, i32
  }
  func.func @transform_5(%arg0: i32, %arg1: i32, %arg2: memref<2x1xi32, #tpu.memory_space<smem>>, %arg3: memref<2x1xi32, #tpu.memory_space<smem>>) -> (i32, i32) {
    %c0_i32 = arith.constant 0 : i32
    %c0_i32_0 = arith.constant 0 : i32
    %c0_i32_1 = arith.constant 0 : i32
    return %c0_i32, %c0_i32_0 : i32, i32
  }
  func.func @transform_6(%arg0: i32, %arg1: i32, %arg2: memref<2x1xi32, #tpu.memory_space<smem>>, %arg3: memref<2x1xi32, #tpu.memory_space<smem>>) -> (i32, i32) {
    %c0_i32 = arith.constant 0 : i32
    %c0_i32_0 = arith.constant 0 : i32
    %c0_i32_1 = arith.constant 0 : i32
    return %c0_i32, %c0_i32_0 : i32, i32
  }
  func.func @transform_7(%arg0: i32, %arg1: i32, %arg2: memref<2x1xi32, #tpu.memory_space<smem>>, %arg3: memref<2x1xi32, #tpu.memory_space<smem>>) -> (i32, i32) {
    %c0_i32 = arith.constant 0 : i32
    %c0_i32_0 = arith.constant 0 : i32
    %c0_i32_1 = arith.constant 0 : i32
    return %c0_i32, %c0_i32_0 : i32, i32
  }
  func.func @transform_8(%arg0: i32, %arg1: i32, %arg2: memref<2x1xi32, #tpu.memory_space<smem>>, %arg3: memref<2x1xi32, #tpu.memory_space<smem>>) -> (i32, i32) {
    %c0_i32 = arith.constant 0 : i32
    %c0_i32_0 = arith.constant 0 : i32
    %c0_i32_1 = arith.constant 0 : i32
    return %c0_i32, %c0_i32_0 : i32, i32
  }
  func.func @transform_9(%arg0: i32, %arg1: i32, %arg2: memref<2x1xi32, #tpu.memory_space<smem>>, %arg3: memref<2x1xi32, #tpu.memory_space<smem>>) -> (i32, i32) {
    %c0_i32 = arith.constant 0 : i32
    %c0_i32_0 = arith.constant 0 : i32
    %c0_i32_1 = arith.constant 0 : i32
    return %c0_i32, %c0_i32_0 : i32, i32
  }
  func.func @transform_10(%arg0: i32, %arg1: i32, %arg2: memref<2x1xi32, #tpu.memory_space<smem>>, %arg3: memref<2x1xi32, #tpu.memory_space<smem>>) -> (i32, i32, i32) {
    %c0_i32 = arith.constant 0 : i32
    %c0_i32_0 = arith.constant 0 : i32
    %c0_i32_1 = arith.constant 0 : i32
    return %arg0, %c0_i32, %c0_i32_0 : i32, i32, i32
  }
}

</mosaic_0001>

<bundles_post_ra>
// kernel: tpu_custom_call.1
= control target key start
LH: loop header
LB: loop body
LE: loop exit
PB: predicated region body
PF: predicated region fallthrough
CT: control target
= control target key end

     0   :  { %s1524_s0 = inlined_call_operand.vmem [shape: s32[2,1], index: 0, kind: input, shape index: {}]   ;;  %s1525_s2 = inlined_call_operand.vmem [shape: bf16[32,4], index: 2, kind: input, shape index: {}]   ;;  %s1526_s3 = inlined_call_operand.vmem [shape: bf16[32,3], index: 3, kind: input, shape index: {}]   ;;  %s1527_s4 = inlined_call_operand.vmem [shape: s32[32,1], index: 4, kind: input, shape index: {}]   ;;  %s1528_s5 = inlined_call_operand.vmem [shape: bf16[4,128], index: 5, kind: input, shape index: {}]   ;;  %s1529_s6 = inlined_call_operand.vmem [shape: bf16[3,128], index: 6, kind: input, shape index: {}]   ;;  %s1530_s7 = inlined_call_operand.vmem [shape: f32[1,128], index: 7, kind: input, shape index: {}]   ;;  %s1531_s8 = inlined_call_operand.vmem [shape: bf16[128,128], index: 8, kind: input, shape index: {}]   ;;  %s1532_s9 = inlined_call_operand.vmem [shape: f32[1,128], index: 9, kind: input, shape index: {}]   ;;  %s1533_s10 = inlined_call_operand.vmem [shape: f32[1,128], index: 10, kind: input, shape index: {}]   ;;  %s1534_s11 = inlined_call_operand.vmem [shape: f32[1,128], index: 11, kind: input, shape index: {}]   ;;  %s1535_s12 = inlined_call_operand.hbm [shape: f32[2,8,128], index: 12, kind: output, shape index: {}]   ;;  %s1536_s1 = inlined_call_operand.vmem [shape: s32[2,1], index: 1, kind: input, shape index: {}]  }
   0x1   :  { %1539 = sst [smem:[#allocation10_spill]] %s1529_s6  ;;  %s17_s23 = sshll.u32 %s1524_s0, 4  ;;  %s18_s23 = int_to_ptr.vmem [resolvable:$true] %s17_s23 }
   0x2   :  { %s21_s26 = sshll.u32 %s1536_s1, 4  ;;  %s1101_s27 = scalar_lea.vmem %s18_s23, 32  ;;  %s22_s26 = int_to_ptr.vmem [resolvable:$true] %s21_s26 }
   0x3   :  { %p1102_p0 = scmp.ne.s32.totalorder %s18_s23, %s1101_s27  ;;  %p1106_p1 = scmp.lt.s32.totalorder %s18_s23, %s18_s23 }
   0x4   :  { %p1107_p2 = scmp.lt.s32.totalorder %s1101_s27, %s1101_s27 }
   0x6   :  { %p1108_p3 = por %p1107_p2, %p1106_p1 }
   0x8   :  { %p1109_p4 = pnand %p1108_p3, %p1102_p0 }
   0xa   :  { %1112 = shalt.err (!%p1109_p4)  }
   0xb   :  { %s1215_s28 = smov [#allocation3]   ;;  %s1113_s29 = scalar_lea.vmem %s22_s26, 32 }
   0xc   :  { %20 = dma.vmem_to_smem %s18_s23, 32, %s1215_s28, [#allocation2] }
   0xd   :  { %p1114_p5 = scmp.ne.s32.totalorder %s22_s26, %s1113_s29  ;;  %p1118_p6 = scmp.lt.s32.totalorder %s22_s26, %s22_s26 }
   0xe   :  { %p1119_p7 = scmp.lt.s32.totalorder %s1113_s29, %s1113_s29 }
  0x10   :  { %p1120_p8 = por %p1119_p7, %p1118_p6 }
  0x12   :  { %p1121_p9 = pnand %p1120_p8, %p1114_p5 }
  0x14   :  { %1124 = shalt.err (!%p1121_p9)  }
  0x15   :  { %s1216_s0 = smov [#allocation4]  }
  0x16   :  { %24 = dma.vmem_to_smem %s22_s26, 32, %s1216_s0, [#allocation2] }
  0x17   :  { %1181 = dma.done.wait [#allocation2], 64 }
  0x18   :  { %1182 = vsyncadd [#allocation2], 4294967232 }
  0x19   :  { %26 = sfence }
  0x1a   :  { %27 = vsyncpa [#allocation6], 0 }
  0x1b   :  { %29 = vsyncpa [#allocation6 + $0x1], 0  ;;  %s1295_s1 = smov 0   ;;  %s1297_s30 = smov 0  }
  0x1c   :  { %s1299_s13 = smov 0   ;;  %s1301_s14 = smov 0  }
  0x1d   :  { %s1303_s15 = smov 0   ;;  %s1305_s16 = smov 0  }
  0x1e LB: > { %s935_s17 = sadd.s32 4294967295, %s1209_s16   ;;  %s936_s18 = sadd.s32 4294967294, %s1209_s16   ;;  %s1209_s16 = sphi %s1305_s16, %s35_s16   ;;  %s1205_s15 = sphi %s1303_s15, %s1550_s15   ;;  %s1201_s14 = sphi %s1301_s14, %s1549_s14   ;;  %s1197_s13 = sphi %s1299_s13, %s1548_s13   ;;  %s1193_s30 = sphi %s1297_s30, %s1547_s30   ;;  %s1189_s1 = sphi %s1295_s1, %s1546_s1  }
  0x1f   : > { %s47_s19 = sadd.s32 1, %s1205_s15  ;;  %s285_s20 = sadd.s32 1, %s1197_s13 }
  0x20   : > { %p49_p10 = scmp.ge.s32.totalorder %s47_s19, 2  ;;  %p295_p11 = scmp.ne.s32.totalorder %s1197_s13, %s1193_s30 }
  0x21   : > { %p296_p12 = scmp.eq.s32.totalorder %s935_s17, 1  ;;  %p301_p13 = scmp.ne.s32.totalorder %s1193_s30, %s1189_s1 }
  0x22   : > { %s1552_s19 = smov (%p49_p10, %s47_s19), 0  ;;  %p302_p1 = scmp.eq.s32.totalorder %s936_s18, 1 }
  0x23   : > { %1540 = sst [smem:[#allocation9_spill]] %s1552_s19  ;;  %p1335_p0 = por %p296_p12, %p295_p11 }
  0x24   : > { %s282_s22 = ssub.s32 %s1205_s15, %s1552_s19  ;;  %p939_p2 = scmp.ge.s32.totalorder %s1209_s16, 1 }
  0x25   : > { %p283_p3 = scmp.eq.s32.totalorder %s282_s22, 0  ;;  %p1342_p4 = por %p302_p1, %p301_p13 }
  0x26   : > { %p374_p5 = scmp.lt.s32.totalorder %s1209_s16, 3 }
  0x27   : > { %s1348_s24 = scalar_select %p283_p3, %s1197_s13, %s285_s20  }
  0x28   : > { %p375_p6 = pnand %p939_p2, %p374_p5 }
  0x29   : > { %s1537_s25 = sand.u32 (!%p375_p6), 1, %s1193_s30   ;;  %s1543_s6 = sld [smem:[#allocation10_spill]] (!%p375_p6)  ;;  %v1217_v1 = vmov (!%p375_p6), 0.0   ;;  %vm470_vm0 = vcmask (!%p375_p6), 1040384   ;;  %vm471_vm1 = vcmask (!%p375_p6), 1041408   ;;  %v1218_v2 = vmov (!%p375_p6), 65535  }
  0x2a   : > { %378 = sbr.rel (%p375_p6) target bundleno = 722 (0x2d2), region = 60  ;;  %s940_s28 = sshll.u32 (!%p375_p6), %s1537_s25, 3  ;;  %985 = vmatprep.subr.bf16.mxu1 (!%p375_p6), %v1217_v1  ;;  %997 = vmatprep.subr.bf16.mxu0 (!%p375_p6), %v1217_v1  ;;  %v472_v3 = vsel (!%p375_p6), %vm470_vm0, 4294967295, %v1218_v2  ;;  %vm1219_vm2 = vmmov (!%p375_p6), 0   ;;  %v1220_v4 = vmov (!%p375_p6), -1e+30  }
  0x2b   : > { %s941_s29 = sshll.u32 (!%p375_p6), %s1201_s14, 1  ;;  %987 = vmatprep.mubr.msk.bf16.mxu1 (!%p375_p6), %vm1219_vm2, %v1217_v1  ;;  %1013 = vmatprep.mubr.msk.bf16.mxu0 (!%p375_p6), %vm1219_vm2, %v1217_v1  ;;  %s1359_s0 = scalar_lea.vmem (!%p375_p6), [#allocation5], %s940_s28  ;;  %v473_v5 = vsel (!%p375_p6), %vm471_vm1, %v472_v3, 0  ;;  %v1092_v6 = vld [vmem:[%s1531_s8] sm:$0xff] (!%p375_p6)   ;;  %v1093_v9 = vld [vmem:[%s1531_s8 + $0x8] sm:$0xff] (!%p375_p6)   ;;  %vm466_vm3 = vcmask (!%p375_p6), 23552  }
  0x2c   : > { %p427_p7 = scmp.lt.s32.totalorder (!%p375_p6), %s941_s29, 3  ;;  %454 = vst [vmem:[%s1359_s0] sm:$0xff] (!%p375_p6), %v1220_v4  ;;  %v457_v8 = vld [vmem:[%s1528_s5] sm:$0x3] (!%p375_p6)  ;;  %998 = vmatpush3.bf16.msra.mxu0 (!%p375_p6), %v1092_v6  ;;  %v1094_v12 = vld [vmem:[%s1531_s8 + $0x10] sm:$0xff] (!%p375_p6)   ;;  %vm523_vm4 = vcmask (!%p375_p6), 31744   ;;  %v1095_v14 = vld [vmem:[%s1531_s8 + $0x18] sm:$0xff] (!%p375_p6)  }
  0x2d   : > { %999 = vmatprep.subr.bf16.mxu0 (!%p375_p6), %v1217_v1  ;;  %v528_v11 = vsel (!%p375_p6), %vm471_vm1, %v457_v8, 0  ;;  %v1096_v15 = vld [vmem:[%s1531_s8 + $0x20] sm:$0xff] (!%p375_p6)   ;;  %v1097_v16 = vld [vmem:[%s1531_s8 + $0x28] sm:$0xff] (!%p375_p6)   ;;  %v1098_v17 = vld [vmem:[%s1531_s8 + $0x30] sm:$0xff] (!%p375_p6)   ;;  %s1403_s19 = sshll.u32 (!%p375_p6), %s1201_s14, 7  ;;  %v1221_v19 = vmov (!%p375_p6), 0  }
  0x2e   : > { %v1099_v18 = vld [vmem:[%s1531_s8 + $0x38] sm:$0xff] (!%p375_p6)   ;;  %1089 = vset.pattern.permute.xlu1 (!%p375_p6), %v1221_v19  ;;  %1088 = vset.pattern.permute.xlu0 (!%p375_p6), %v1221_v19  ;;  %s1406_s27 = sld [smem:[#allocation3 + %s1403_s19]] (!%p375_p6)  ;;  %v951_v33 = vld [vmem:[%s1530_s7] ss:$0 sm:$0xff] (!%p375_p6) }
  0x2f   : > { %v460_v0 = vld [vmem:[%s1543_s6] sm:$0x3] (!%p375_p6) }
  0x30   : > { %v475_v7 = vand.u32 (!%p375_p6), %v473_v5, %v460_v0  ;;  %1000 = vmatpush3.bf16.msra.mxu0 (!%p375_p6), %v1093_v9  ;;  %v952_v44 = vld [vmem:[%s1532_s9] ss:$0 sm:$0xff] (!%p375_p6) }
  0x31   : > { %s1554_s29 = smov (!%p427_p7, %s941_s29), 3  ;;  %1001 = vmatprep.subr.bf16.mxu0 %v1217_v1  ;;  %v961_v50 = vld [vmem:[%s1533_s10] ss:$0 sm:$0xff] }
  0x32   : > { %986 = vmatpush3.bf16.msra.mxu1 %v475_v7  ;;  %s942_s28 = sshll.u32 %s1554_s29, 2  ;;  %s946_s6 = sshll.u32 %s1554_s29, 3  ;;  %v962_v55 = vld [vmem:[%s1534_s11] ss:$0 sm:$0xff] }
  0x33   : > { %991 = vmatprep.subr.bf16.mxu1 %v1217_v1  ;;  %s430_s25 = scalar_lea.vmem %s1525_s2, %s942_s28  ;;  %s438_s20 = scalar_lea.vmem %s1526_s3, %s942_s28 }
  0x34   : > { %v1090_v10 = vld [vmem:[%s438_s20] sm:$0xff]   ;;  %1002 = vmatpush3.bf16.msra.mxu0 %v1094_v12  ;;  %s446_s18 = scalar_lea.vmem %s1527_s4, %s946_s6  ;;  %s748_s14 = sadd.s32 1, %s1406_s27  ;;  %v726_v22 = vstv %s1406_s27 }
  0x35   : > { %988 = vmatmul.mubr.msk.bf16.vlgmr.msra.gmra.mrb[0].mxu1 %vm466_vm3, %v1090_v10  ;;  %1003 = vmatprep.subr.bf16.mxu0 %v1217_v1  ;;  %v1091_v13 = vld [vmem:[%s430_s25] sm:$0xff]   ;;  %s1412_s25 = sld [smem:[#allocation4 + %s1403_s19]]  ;;  %v1416_v21 = vld [vmem:[%s446_s18 + $0x8] sm:$0xff]  ;;  %v749_v23 = vstv %s748_s14 }
  0x36   : > { %992 = vmatpush3.bf16.msra.mxu1 %v528_v11  ;;  %993 = vmatprep.mubr.msk.bf16.mxu1 %vm1219_vm2, %v1217_v1  ;;  %v1414_v20 = vld [vmem:[%s446_s18] sm:$0xff]  ;;  %vm728_vm6 = vcmp.eq.s32.totalorder %v1416_v21, %v726_v22  ;;  %vm751_vm8 = vcmp.eq.s32.totalorder %v1416_v21, %v749_v23 }
  0x37   : > { %vm727_vm5 = vcmp.eq.s32.totalorder %v1414_v20, %v726_v22  ;;  %vm750_vm7 = vcmp.eq.s32.totalorder %v1414_v20, %v749_v23  ;;  %v730_v26 = vsel %vm728_vm6, 1, %v1221_v19  ;;  %v753_v27 = vsel %vm751_vm8, 1, %v1221_v19 }
  0x38   : > { %1004 = vmatpush3.bf16.msra.mxu0 %v1095_v14  ;;  %v729_v24 = vsel %vm727_vm5, 1, %v1221_v19  ;;  %v752_v25 = vsel %vm750_vm7, 1, %v1221_v19 }
  0x39   : > { %1005 = vmatprep.subr.bf16.mxu0 %v1217_v1  ;;  %732 = vperm.xlu0 %1088, %v729_v24  }
  0x3a   : > { %755 = vperm.xlu1 %1089, %v752_v25  }
  0x3b   : > { %p964_p8 = scmp.gt.s32.totalorder %s1406_s27, %s1412_s25 }
  0x3c   : > { %1006 = vmatpush3.bf16.msra.mxu0 %v1096_v15  ;;  %s775_s29 = scalar_lea.vmem (!%p964_p8), %s1359_s0, %s1406_s27 [#allocation5] }
  0x3d   : > { %994 = vmatmul.mubr.msk.bf16.vlgmr.msra.gmra.mrb[4].mxu1 %vm523_vm4, %v1091_v13  ;;  %1007 = vmatprep.subr.bf16.mxu0 %v1217_v1 }
  0x3e   : > { %735 = vperm.xlu0 %1088, %v730_v26   ;;  %758 = vperm.xlu1 %1089, %v753_v27  }
  0x40   : > { %1008 = vmatpush3.bf16.msra.mxu0 %v1097_v16 }
  0x41   : > { %1009 = vmatprep.subr.bf16.mxu0 %v1217_v1 }
  0x44   : > { %1010 = vmatpush3.bf16.msra.mxu0 %v1098_v17  ;;  %v776_v17 = vld [vmem:[%s775_s29] sm:$0x1] (!%p964_p8) }
  0x45   : > { %1011 = vmatprep.subr.bf16.mxu0 %v1217_v1 }
  0x48   : > { %1012 = vmatpush3.bf16.msra.mxu0 %v1099_v18 }
  0xb8   : > { %v733_v48 = vpop.permute.xlu0 %732 }
  0xb9   : > { %v756_v46 = vpop.permute.xlu1 %755  ;;  %vm737_vm10 = vcmp.eq.s32.totalorder %v733_v48, 1 }
  0xba   : > { %vm760_vm9 = vcmp.eq.s32.totalorder %v756_v46, 1 }
  0xbd   : > { %v759_v60 = vpop.permute.xlu1 %758  ;;  %v736_v61 = vpop.permute.xlu0 %735 }
  0xbe   : > { %vm761_vm11 = vcmp.eq.s32.totalorder %v759_v60, 1  ;;  %vm738_vm12 = vcmp.eq.s32.totalorder %v736_v61, 1 }
 0x108   : > { %v511_v28 = vpop.f32.mrb[0].mxu1 }
 0x109   : > { %v989_v29 = vpop.f32.mrb[1].mxu1 }
 0x10a   : > { %v514_v30 = vpop.f32.mrb[2].mxu1 }
 0x10b   : > { %v990_v31 = vpop.f32.mrb[3].mxu1 }
 0x110   : > { %v564_v32 = vpop.f32.mrb[4].mxu1 }
 0x111   : > { %v565_v34 = vadd.f32 %v564_v32, %v511_v28  ;;  %v995_v35 = vpop.f32.mrb[5].mxu1 }
 0x112   : > { %v567_v36 = vpop.f32.mrb[6].mxu1 }
 0x113   : > { %v578_v37 = vadd.f32 %v951_v33, %v565_v34  ;;  %v568_v38 = vadd.f32 %v567_v36, %v514_v30  ;;  %v996_v39 = vpop.f32.mrb[7].mxu1 }
 0x115   : > { %v579_v40 = vadd.f32 %v951_v33, %v568_v38  ;;  %v580_v41 = vmax.f32 %v578_v37, 0.0 }
 0x117   : > { %v581_v42 = vmax.f32 %v579_v40, 0.0 }
 0x119   : > { %v582_v43 = vpack.c.bf16 %v581_v42, %v580_v41 }
 0x11b   : > { %1014 = vmatmul.mubr.bf16.vlgmr.msra.gmra.mrb[0].mxu0 %v582_v43 }
 0x1ee   : > { %v688_v45 = vpop.f32.mrb[0].mxu0 }
 0x1ef   : > { %v689_v47 = vadd.f32 %v952_v44, %v688_v45  ;;  %v1015_v49 = vpop.f32.mrb[1].mxu0 }
 0x1f0   : > { %v691_v51 = vpop.f32.mrb[2].mxu0 }
 0x1f1   : > { %v695_v52 = vmax.f32 %v689_v47, 0.0  ;;  %v692_v53 = vadd.f32 %v952_v44, %v691_v51  ;;  %v1016_v54 = vpop.f32.mrb[3].mxu0 }
 0x1f3   : > { %v704_v56 = vmul.f32 %v961_v50, %v695_v52  ;;  %v696_v57 = vmax.f32 %v692_v53, 0.0 }
 0x1f5   : > { %v1438_v58 = vadd.f32 %v962_v55, %v704_v56  ;;  %v705_v59 = vmul.f32 %v961_v50, %v696_v57 }
 0x1f7   : > { %v1440_v62 = vadd.f32 %v962_v55, %v705_v59  ;;  %v762_v63 = vsel %vm760_vm9, %v1438_v58, -1e+30  ;;  %v739_v0 = vsel %vm737_vm10, %v1438_v58, -1e+30 }
 0x1f9   : > { %v763_v1 = vsel %vm761_vm11, %v1440_v62, -1e+30  ;;  %v740_v2 = vsel %vm738_vm12, %v1440_v62, -1e+30 }
 0x1fa   : > { %v764_v3 = vmax.f32 %v762_v63, %v763_v1  ;;  %v741_v4 = vmax.f32 %v739_v0, %v740_v2 }
 0x1fc   : > { %v765_v5 = vrot.slane %v764_v3, 4  ;;  %v742_v6 = vrot.slane %v741_v4, 4 }
 0x1fe   : > { %v766_v7 = vmax.f32 %v764_v3, %v765_v5  ;;  %v743_v8 = vmax.f32 %v741_v4, %v742_v6 }
 0x200   : > { %v767_v9 = vrot.slane %v766_v7, 2  ;;  %v744_v10 = vrot.slane %v743_v8, 2  ;;  %774 = sbr.rel (%p964_p8) target bundleno = 523 (0x20b), region = 68 }
 0x202   : > { %v768_v11 = vmax.f32 %v766_v7, %v767_v9  ;;  %v745_v12 = vmax.f32 %v743_v8, %v744_v10 }
 0x204   : > { %v769_v13 = vrot.slane %v768_v11, 1  ;;  %v746_v14 = vrot.slane %v745_v12, 1 }
 0x206   : > { %v770_v15 = vmax.f32 %v768_v11, %v769_v13  ;;  %v747_v16 = vmax.f32 %v745_v12, %v746_v14 }
 0x208   : > { %v777_v18 = vmax.f32 %v776_v17, %v747_v16 }
 0x20a   : > { %778 = vst [vmem:[%s775_s29] sm:$0x1] %v777_v18 }
 0x20b PF: > { %p965_p9 = scmp.gt.s32.totalorder %s748_s14, %s1412_s25 }
 0x20c   : > { %s878_s20 = scalar_lea.vmem (!%p965_p9), %s1359_s0, %s1406_s27 [#allocation5] }
 0x20d   : > { %782 = sbr.rel (%p965_p9) target bundleno = 533 (0x215), region = 72 }
 0x211   : > { %v966_v19 = vld [vmem:[%s878_s20 + $0x1] sm:$0x1] (!%p965_p9) }
 0x212   : > { %v785_v22 = vmax.f32 (!%p965_p9), %v966_v19, %v770_v15 }
 0x214   : > { %967 = vst [vmem:[%s878_s20 + $0x1] sm:$0x1] %v785_v22 }
 0x215 PF: > { %s787_s22 = sadd.s32 2, %s1406_s27   ;;  %s788_s26 = sadd.s32 1, %s1412_s25 }
 0x216   : > { %p890_p10 = scmp.ge.s32.totalorder %s787_s22, %s788_s26 }
 0x218   : > { %891 = sbr.rel (%p890_p10) target bundleno = 697 (0x2b9), region = 117 }
 0x21f LB: >> { %v1222_v23 = vmov 0   ;;  %v795_v24 = vstv %s1213_s22  ;;  %s817_s27 = scalar_lea.vmem %s1359_s0, %s1213_s22 [#allocation5]  ;;  %s792_s22 = sadd.s32 1, %s1213_s22   ;;  %s1213_s22 = sphi %s787_s22, %s792_s22  }
 0x220   : >> { %1100 = vset.pattern.permute.xlu0 %v1222_v23  ;;  %vm796_vm13 = vcmp.eq.s32.totalorder %v1414_v20, %v795_v24  ;;  %vm797_vm14 = vcmp.eq.s32.totalorder %v1416_v21, %v795_v24  ;;  %v818_v37 = vld [vmem:[%s817_s27] sm:$0x1]  ;;  %p791_p11 = scmp.ge.s32.totalorder %s792_s22, %s788_s26 }
 0x221   : >> { %v798_v25 = vsel %vm796_vm13, 1, %v1222_v23  ;;  %v799_v26 = vsel %vm797_vm14, 1, %v1222_v23 }
 0x222   : >> { %801 = vperm.xlu0 %1100, %v798_v25  }
 0x226   : >> { %804 = vperm.xlu0 %1100, %v799_v26  }
 0x2a1   : >> { %v802_v27 = vpop.permute.xlu0 %801 }
 0x2a2   : >> { %vm806_vm15 = vcmp.eq.s32.totalorder %v802_v27, 1 }
 0x2a3   : >> { %v808_v29 = vsel %vm806_vm15, %v1438_v58, -1e+30 }
 0x2a5   : >> { %v805_v28 = vpop.permute.xlu0 %804 }
 0x2a6   : >> { %vm807_vm0 = vcmp.eq.s32.totalorder %v805_v28, 1 }
 0x2a7   : >> { %v809_v30 = vsel %vm807_vm0, %v1440_v62, -1e+30 }
 0x2a8   : >> { %v810_v31 = vmax.f32 %v808_v29, %v809_v30 }
 0x2aa   : >> { %v811_v32 = vrot.slane %v810_v31, 4 }
 0x2ac   : >> { %v812_v33 = vmax.f32 %v810_v31, %v811_v32 }
 0x2ae   : >> { %v813_v34 = vrot.slane %v812_v33, 2 }
 0x2b0   : >> { %v814_v35 = vmax.f32 %v812_v33, %v813_v34 }
 0x2b2   : >> { %v815_v36 = vrot.slane %v814_v35, 1  ;;  %794 = sbr.rel (!%p791_p11) target bundleno = 543 (0x21f), region = 123 }
 0x2b4   : >> { %v816_v38 = vmax.f32 %v814_v35, %v815_v36 }
 0x2b6   : >> { %v819_v39 = vmax.f32 %v818_v37, %v816_v38 }
 0x2b8   : >> { %820 = vst [vmem:[%s817_s27] sm:$0x1] %v819_v39 }
 0x2b9 PF: > { %s1480_s28 = scalar_lea.hbm %s1535_s12, %s1403_s19  ;;  %s835_s17 = sshll.u32 %s1359_s0, 4  ;;  %s836_s17 = int_to_ptr.vmem [resolvable:$true] %s835_s17 }
 0x2ba   : > { %s1544_s18 = sand.u32 1, %s1193_s30   ;;  %s1125_s20 = scalar_lea.vmem %s836_s17, 128 }
 0x2bb   : > { %s822_s29 = scalar_lea.sflag [#allocation6], %s1544_s18  ;;  %p1126_p12 = scmp.ne.s32.totalorder %s836_s17, %s1125_s20 }
 0x2bc   : > { %s1223_s22 = smov [#allocation5]  }
 0x2bd   : > { %p1127_p13 = pnand %p1126_p12, %p1335_p0  ;;  %s1129_s25 = sshll.u32 %s1223_s22, 4  ;;  %s1130_s25 = int_to_ptr.vmem [resolvable:$false] %s1129_s25 }
 0x2be   : > { %s1131_s26 = scalar_lea.vmem %s1130_s25, 256  ;;  %p1132_p2 = scmp.lt.s32.totalorder %s836_s17, %s1130_s25 }
 0x2bf   : > { %p1128_p1 = pneg %p1127_p13  ;;  %p1133_p3 = scmp.lt.s32.totalorder %s1131_s26, %s1125_s20 }
 0x2c1   : > { %p1134_p5 = por %p1133_p3, %p1132_p2 }
 0x2c3   : > { %p1135_p6 = pnand %p1134_p5, %p1128_p1 }
 0x2c5   : > { %1138 = shalt.err (!%p1135_p6)
}
 0x2c6   : > { %s1139_s0 = scalar_lea.hbm %s1480_s28, 128  ;;  %s1143_s14 = scalar_lea.hbm %s1535_s12, 256 }
 0x2c7   : > { %p1140_p7 = scmp.ne.s32.totalorder %s1480_s28, %s1139_s0  ;;  %p1144_p10 = scmp.lt.u32.totalorder %s1480_s28, %s1535_s12 }
 0x2c8   : > { %p1145_p11 = scmp.lt.u32.totalorder %s1143_s14, %s1139_s0  ;;  %p1147_p13 = scmp.lt.u32.totalorder %s1139_s0, %s1480_s28 }
 0x2c9   : > { %p1141_p8 = pnand %p1140_p7, %p1335_p0 }
 0x2ca   : > { %p1146_p12 = por %p1145_p11, %p1144_p10 }
 0x2cb   : > { %p1142_p9 = pneg %p1141_p8 }
 0x2cc   : > { %p1148_p1 = por %p1147_p13, %p1146_p12 }
 0x2ce   : > { %p1149_p2 = pnand %p1148_p1, %p1142_p9 }
 0x2d0   : > { %1152 = shalt.err (!%p1149_p2)
}
 0x2d1   : > { %1017 = dma.vmem_to_hbm [thread:$0]  (%p1335_p0), %s836_s17, 128, %s1480_s28, %s822_s29  }
 0x2d2 PF: > { %p1023_p3 = scmp.ge.s32.totalorder %s1209_s16, 2  ;;  %s847_s20 = sand.u32 1, %s1189_s1  }
 0x2d3   : > { %s848_s22 = scalar_lea.sflag [#allocation6], %s847_s20 }
 0x2d4   : > { %p1020_p5 = pnand %p1023_p3, %p1342_p4 }
 0x2d6   : > { %1184 = dma.done.wait (!%p1020_p5), %s848_s22, 128  }
 0x2d7   : > { %1186 = vsyncadd (!%p1020_p5), %s848_s22, 4294967168  ;;  %s35_s16 = sadd.s32 1, %s1209_s16   ;;  %s1545_s21 = sld [smem:[#allocation9_spill]] }
 0x2d8   : > { %p32_p6 = scmp.ge.s32.totalorder %s35_s16, 4   ;;  %s1546_s1 = smov %s1193_s30 }
 0x2d9   : > { %s1547_s30 = smov %s1197_s13  ;;  %s1548_s13 = smov %s1348_s24 }
 0x2da   : > { %s1549_s14 = smov %s1205_s15  ;;  %34 = sbr.rel (!%p32_p6) target bundleno = 30 (0x1e), region = 134 }
 0x2dd   : > { %s1550_s15 = smov %s1545_s21 }
 0x2e1   :  { %853 = vsyncpa [#allocation6], 1 }
 0x2e2   :  { %855 = vsyncpa [#allocation6 + $0x1], 1 }

</bundles_post_ra>
